<compile_context>
chip_gen: v7x
topology: tpu7x:2x2x1
jax: 0.10.0
libtpu: 0.0.40
codegen_flags: <defaults>
</compile_context>

<pallas_src>
import functools
import itertools
import math

import numpy as np
import jax
import jax.numpy as jnp
from jax.experimental import pallas as pl
from jax.experimental.pallas import tpu as pltpu


def _round_up(x, m):
    return ((x + m - 1) // m) * m


def _tpu_vmem_and_tn_cap():
    """Return (physical VMEM bytes per core, max N tile) for the local TPU."""
    kind = ""
    try:
        kind = jax.devices()[0].device_kind.lower()
    except Exception:
        pass
    if "v7" in kind:
        phys = 64 * 1024 * 1024            # v7x: 64 MiB per TensorCore
    elif ("v6" in kind) or ("v5" in kind) or ("v4" in kind):
        phys = 128 * 1024 * 1024
    else:
        phys = 64 * 1024 * 1024            # conservative for unknown chips
    tn_cap = 256 if "v5" in kind else 512  # v5e: 128x128 MXU + 1 vst slot
    return phys, tn_cap


def _select_tiles(M_pad, C_in, C_out, order, in_bytes, phys_vmem, tn_cap):
    """Pick (tm, tn) under a generation-aware VMEM budget."""
    budget = int(phys_vmem * 0.55)   # headroom for compiler scratch / spills

    def footprint(tm, tn):
        return (2 * tm * C_in * in_bytes        # x tile (double-buffered)
                + 2 * C_in * tn * in_bytes      # W^T tile (double-buffered)
                + 2 * tm * tn * 4               # out tile (double-buffered)
                + 2 * tn * 4                    # bias tile
                + (order + 3) * tm * tn * 4)    # power sums + working set

    # N tile: full C_out when small; otherwise a multiple of 128 capped at tn_cap.
    if C_out <= tn_cap:
        tn = C_out
    else:
        tn = tn_cap
        while tn > 128 and footprint(8, tn) > budget:
            tn -= 128

    # M tile: largest power-of-two multiple of 8 that fits the budget.
    tm_cap = min(1024, _round_up(M_pad, 8))
    tm = 8
    while tm * 2 <= tm_cap and footprint(tm * 2, tn) <= budget:
        tm *= 2

    # Keep at least two grid steps along a parallel axis when possible so both
    # v7x TensorCores get work (costs ~0.35us elsewhere; essentially free).
    gm = -(-M_pad // tm)
    gn = -(-C_out // tn)
    if gm * gn == 1 and M_pad >= 16:
        tm = _round_up(-(-M_pad // 2), 8)
    return tm, tn


def _ho_linear_kernel(ow_ref, x_ref, wt_ref, b_ref, o_ref, *,
                      dim_split, nblock, order):
    """One (tm, C_in) x tile x one (C_in, tn) W^T slab -> (tm, tn) output tile.

    ips[i] = x[:, s_i:e_i] @ W^T[s_i:e_i, :]   (per-block partial linears, MXU)
    result = ow[0] + sum_{k=1..order} ow[k] * e_k(ips) + bias
    where e_k is the k-th elementary symmetric polynomial (== the sum over
    combinations of k blocks of their products, matching the torch forward).
    """
    # Accumulate power sums p_k = sum_i ips[i]**k block-by-block so only
    # `order` (tm, tn) accumulators stay live (not all nblock partials) and
    # each block's VPU accumulation overlaps the next block's MXU matmul.
    # TODO(synk): per-block K = C_in/nblock is not padded to the MXU depth
    # (128/256); padding would change the packed x layout, so it is skipped.
    p = [None] * (order + 1)
    for i in range(nblock):
        s, e = dim_split[i], dim_split[i + 1]
        ip = jnp.dot(x_ref[:, s:e], wt_ref[s:e, :],
                     preferred_element_type=jnp.float32)
        pw = ip
        for k in range(1, order + 1):
            if k > 1:
                pw = pw * ip
            p[k] = pw if p[k] is None else p[k] + pw

    # Newton's identities: k * e_k = sum_{j=1..k} (-1)^(j-1) e_{k-j} p_j, e_0=1.
    # (For order 2 this is e_2 = (p_1**2 - p_2) / 2.)
    e = [None] * (order + 1)
    e[1] = p[1]
    result = p[1] * ow_ref[1] + ow_ref[0]
    for k in range(2, order + 1):
        acc = None
        for j in range(1, k + 1):
            term = p[j] if j == k else e[k - j] * p[j]
            if j % 2 == 0:
                term = -term
            acc = term if acc is None else acc + term
        e[k] = acc * (1.0 / k)
        result = result + e[k] * ow_ref[k]

    o_ref[...] = (result + b_ref[...]).astype(o_ref.dtype)


class BaseHOLinearPallas:
    """JAX/Pallas port of BaseHOLinear with deterministic in-script init."""

    def __init__(self, in_channels, out_channels, key, bias=True, nblock=2,
                 order=2, set_order_weights=None, softmax_order_weights=False,
                 mxu_dtype=jnp.float32):
        assert order <= nblock, "order should be less than or equal to nblock"
        self.in_channels = in_channels
        self.out_channels = out_channels
        self.nblock = nblock
        self.order = order
        self.softmax_order_weights = softmax_order_weights
        self.dim_split = [in_channels // nblock * i
                          for i in range(nblock)] + [in_channels]

        # Xavier-uniform init (matches torch.nn.init.xavier_uniform_).
        bound = math.sqrt(6.0 / (in_channels + out_channels))
        self.weight = jax.random.uniform(
            key, (out_channels, in_channels), jnp.float32, -bound, bound)

        # Pre-transposed (C_in, C_out) copy stored ONCE at init in the MXU
        # input dtype (bf16 halves HBM/VMEM traffic on v6e/v7x; f32 default
        # keeps exact parity with the torch reference).
        self.mxu_dtype = jnp.dtype(mxu_dtype)
        self.wt = jnp.asarray(self.weight.T, dtype=self.mxu_dtype)

        # torch reset_parameters zero-inits the bias; zeros are passed when
        # bias=False too (numerically identical to "no bias").
        self.has_bias = bias
        self.bias = jnp.zeros((out_channels,), jnp.float32)
        self.bias2d = self.bias.reshape(1, out_channels)

        if set_order_weights is None:
            self.order_weights = jnp.array([0.0, 1.0] + [0.0] * (order - 1),
                                           jnp.float32)
        else:
            assert len(set_order_weights) == order + 1
            self.order_weights = jnp.array(set_order_weights, jnp.float32)

    def _effective_config(self):
        """Mirror the torch forward's order==1 short-circuit (plain linear)."""
        if self.order == 1:
            return jnp.array([0.0, 1.0], jnp.float32), [0, self.in_channels], 1, 1
        ow = self.order_weights
        if self.softmax_order_weights:
            ow = jax.nn.softmax(ow, axis=0)
        return ow, self.dim_split, self.nblock, self.order

    def __call__(self, x):
        ow, dim_split, nblock, order = self._effective_config()
        C_in, C_out = self.in_channels, self.out_channels
        lead = x.shape[:-1]
        M = int(np.prod(lead)) if lead else 1

        x2 = x.reshape(M, C_in).astype(self.mxu_dtype)
        # Pad rows up to a multiple of 8 (sublane rule) instead of falling
        # back to one monolithic block for ragged M.
        M_pad = _round_up(max(M, 1), 8)
        if M_pad != M:
            x2 = jnp.pad(x2, ((0, M_pad - M), (0, 0)))

        in_bytes = self.mxu_dtype.itemsize
        phys_vmem, tn_cap = _tpu_vmem_and_tn_cap()
        tm, tn = _select_tiles(M_pad, C_in, C_out, order, in_bytes,
                               phys_vmem, tn_cap)
        gm, gn = pl.cdiv(M_pad, tm), pl.cdiv(C_out, tn)

        kernel = functools.partial(_ho_linear_kernel,
                                   dim_split=tuple(dim_split),
                                   nblock=nblock, order=order)

        flops = 2 * M_pad * C_in * C_out + 6 * M_pad * C_out * nblock * order
        bytes_accessed = ((M_pad * C_in + gm * C_in * C_out) * in_bytes
                          + (M_pad * C_out + C_out) * 4)

        out2 = pl.pallas_call(
            kernel,
            out_shape=jax.ShapeDtypeStruct((M_pad, C_out), jnp.float32),
            grid=(gm, gn),
            in_specs=[
                pl.BlockSpec(memory_space=pltpu.MemorySpace.SMEM),  # order weights
                pl.BlockSpec((tm, C_in), lambda i, j: (i, 0)),      # x row tile
                pl.BlockSpec((C_in, tn), lambda i, j: (0, j)),      # W^T col slab
                pl.BlockSpec((1, tn), lambda i, j: (0, j)),         # bias slab
            ],
            out_specs=pl.BlockSpec((tm, tn), lambda i, j: (i, j)),
            compiler_params=pltpu.CompilerParams(
                dimension_semantics=("parallel", "parallel"),
                vmem_limit_bytes=int(phys_vmem * 3 // 4)),
            cost_estimate=pl.CostEstimate(flops=int(flops),
                                          transcendentals=0,
                                          bytes_accessed=int(bytes_accessed)),
        )(ow, x2, self.wt, self.bias2d)

        if M_pad != M:
            out2 = out2[:M]
        return out2.reshape(*lead, C_out)

    # Pure-JAX reference mirroring the torch forward (explicit combinations),
    # using the same (possibly bf16-rounded) operands the kernel sees.
    def reference(self, x):
        w = jnp.asarray(self.wt, jnp.float32).T          # (C_out, C_in)
        xr = x.astype(self.mxu_dtype).astype(jnp.float32)
        if self.order == 1:
            out = xr @ w.T
            return out + self.bias if self.has_bias else out
        ips = []
        for i in range(self.nblock):
            s, e = self.dim_split[i], self.dim_split[i + 1]
            ips.append(xr[..., s:e] @ w[:, s:e].T)
        ow = self.order_weights
        if self.softmax_order_weights:
            ow = jax.nn.softmax(ow, axis=0)
        result = sum(ips) * ow[1] + ow[0]
        for cur_order in range(2, self.order + 1):
            for comb in itertools.combinations(ips, cur_order):
                prod = comb[0]
                for c in comb[1:]:
                    prod = prod * c
                result = result + prod * ow[cur_order]
        if self.has_bias:
            result = result + self.bias
        return result


if __name__ == "__main__":
    key = jax.random.PRNGKey(0)
    k1, k2, k3, k4, k5, kx1, kx2, kx3 = jax.random.split(key, 8)

    def check(mod, x, rtol=1e-5, atol=1e-5):
        out = mod(x)
        jax.block_until_ready(out)
        ref = mod.reference(x)
        assert out.shape == ref.shape
        np.testing.assert_allclose(np.asarray(out), np.asarray(ref),
                                   rtol=rtol, atol=atol)

    # Case 1: order-2 interactions with non-trivial order weights.
    x1 = jax.random.normal(kx1, (2, 8, 32), jnp.float32)
    check(BaseHOLinearPallas(32, 32, k1, bias=True, nblock=2, order=2,
                             set_order_weights=[0.1, 0.5, 0.3]), x1)

    # Case 2: default parameterized order weights ([0, 1, 0]).
    check(BaseHOLinearPallas(32, 32, k2, bias=True, nblock=2, order=2), x1)

    # Case 3: order 3 over 4 blocks, softmax'ed order weights, no bias,
    # ragged M (3*5 = 15 rows -> padded to 16).
    x3 = jax.random.normal(kx2, (3, 5, 64), jnp.float32)
    check(BaseHOLinearPallas(64, 48, k3, bias=False, nblock=4, order=3,
                             set_order_weights=[0.05, 0.9, 0.2, 0.1],
                             softmax_order_weights=True), x3)

    # Case 4: order==1 short-circuit (plain linear).
    check(BaseHOLinearPallas(32, 32, k4, bias=True, nblock=2, order=1), x1)

    # Case 5: bf16 MXU inputs with f32 accumulation (v6e/v7x fast path).
    x5 = jax.random.normal(kx3, (2, 16, 128), jnp.float32)
    check(BaseHOLinearPallas(128, 128, k5, bias=True, nblock=2, order=2,
                             set_order_weights=[0.1, 0.5, 0.3],
                             mxu_dtype=jnp.bfloat16),
          x5, rtol=1e-3, atol=1e-3)

    print("KERNEL_OK")
</pallas_src>

<mosaic_0001>
module attributes {stable_mosaic.version = 11 : i64} {
  func.func @_ho_linear_kernel(%arg0: i32, %arg1: i32, %arg2: memref<3xf32, #tpu.memory_space<smem>>, %arg3: memref<8x32xf32, #tpu.memory_space<vmem>>, %arg4: memref<32x32xf32, #tpu.memory_space<vmem>>, %arg5: memref<1x32xf32, #tpu.memory_space<vmem>>, %arg6: memref<8x32xf32, #tpu.memory_space<vmem>>) attributes {dimension_semantics = [#tpu.dimension_semantics<parallel>, #tpu.dimension_semantics<parallel>], iteration_bounds = array<i64: 2, 1>, scalar_prefetch = 0 : i64, scratch_operands = 0 : i64, tpu.core_type = #tpu.core_type<tc>, window_params = [{transform_indices = @transform_0, window_bounds = array<i64: 3>}, {transform_indices = @transform_1, window_bounds = array<i64: 8, 32>}, {transform_indices = @transform_2, window_bounds = array<i64: 32, 32>}, {transform_indices = @transform_3, window_bounds = array<i64: 1, 32>}, {transform_indices = @transform_4, window_bounds = array<i64: 8, 32>}]} {
    %c0 = arith.constant 0 : index
    %c0_0 = arith.constant 0 : index
    %0 = vector.load %arg3[%c0, %c0_0] : memref<8x32xf32, #tpu.memory_space<vmem>>, vector<8x16xf32>
    %c0_1 = arith.constant 0 : index
    %c0_2 = arith.constant 0 : index
    %1 = vector.load %arg4[%c0_1, %c0_2] : memref<32x32xf32, #tpu.memory_space<vmem>>, vector<16x32xf32>
    %cst = arith.constant dense<0.000000e+00> : vector<8x32xf32>
    %2 = tpu.matmul %0, %1, %cst {dimension_numbers = #tpu.dot_dimension_numbers<[1], [0], [0], [1], [0, 0, 1, 1], [], []>} : vector<8x16xf32>, vector<16x32xf32>, vector<8x32xf32> -> vector<8x32xf32>
    %3 = arith.mulf %2, %2 : vector<8x32xf32>
    %c0_3 = arith.constant 0 : index
    %c16 = arith.constant 16 : index
    %4 = vector.load %arg3[%c0_3, %c16] : memref<8x32xf32, #tpu.memory_space<vmem>>, vector<8x16xf32>
    %c16_4 = arith.constant 16 : index
    %c0_5 = arith.constant 0 : index
    %5 = vector.load %arg4[%c16_4, %c0_5] : memref<32x32xf32, #tpu.memory_space<vmem>>, vector<16x32xf32>
    %cst_6 = arith.constant dense<0.000000e+00> : vector<8x32xf32>
    %6 = tpu.matmul %4, %5, %cst_6 {dimension_numbers = #tpu.dot_dimension_numbers<[1], [0], [0], [1], [0, 0, 1, 1], [], []>} : vector<8x16xf32>, vector<16x32xf32>, vector<8x32xf32> -> vector<8x32xf32>
    %7 = arith.addf %2, %6 : vector<8x32xf32>
    %8 = arith.mulf %6, %6 : vector<8x32xf32>
    %9 = arith.addf %3, %8 : vector<8x32xf32>
    %c1 = arith.constant 1 : index
    %10 = memref.load %arg2[%c1] : memref<3xf32, #tpu.memory_space<smem>>
    %11 = vector.broadcast %10 : f32 to vector<8x32xf32>
    %12 = arith.mulf %7, %11 : vector<8x32xf32>
    %c0_7 = arith.constant 0 : index
    %13 = memref.load %arg2[%c0_7] : memref<3xf32, #tpu.memory_space<smem>>
    %14 = vector.broadcast %13 : f32 to vector<8x32xf32>
    %15 = arith.addf %12, %14 : vector<8x32xf32>
    %16 = arith.mulf %7, %7 : vector<8x32xf32>
    %cst_8 = arith.constant 0.000000e+00 : f32
    %17 = vector.broadcast %cst_8 : f32 to vector<8x32xf32>
    %18 = arith.subf %17, %9 : vector<8x32xf32>
    %19 = arith.addf %16, %18 : vector<8x32xf32>
    %cst_9 = arith.constant 5.000000e-01 : f32
    %20 = vector.broadcast %cst_9 : f32 to vector<8x32xf32>
    %21 = arith.mulf %19, %20 : vector<8x32xf32>
    %c2 = arith.constant 2 : index
    %22 = memref.load %arg2[%c2] : memref<3xf32, #tpu.memory_space<smem>>
    %23 = vector.broadcast %22 : f32 to vector<8x32xf32>
    %24 = arith.mulf %21, %23 : vector<8x32xf32>
    %25 = arith.addf %15, %24 : vector<8x32xf32>
    %c0_10 = arith.constant 0 : index
    %c0_11 = arith.constant 0 : index
    %26 = vector.load %arg5[%c0_10, %c0_11] : memref<1x32xf32, #tpu.memory_space<vmem>>, vector<1x32xf32>
    %27 = vector.broadcast %26 : vector<1x32xf32> to vector<8x32xf32>
    %28 = arith.addf %25, %27 : vector<8x32xf32>
    %c0_12 = arith.constant 0 : index
    %c0_13 = arith.constant 0 : index
    %29 = vector.load %arg6[%c0_12, %c0_13] : memref<8x32xf32, #tpu.memory_space<vmem>>, vector<8x32xf32>
    tpu.vector_store %arg6[%c0_12, %c0_13], %28 {strides = array<i32>} : memref<8x32xf32, #tpu.memory_space<vmem>>, vector<8x32xf32>,
    return
  }
  func.func @transform_0(%arg0: i32, %arg1: i32) -> i32 {
    %c0_i32 = arith.constant 0 : i32
    %c0_i32_0 = arith.constant 0 : i32
    return %c0_i32 : i32
  }
  func.func @transform_1(%arg0: i32, %arg1: i32) -> (i32, i32) {
    %c0_i32 = arith.constant 0 : i32
    %c0_i32_0 = arith.constant 0 : i32
    return %arg0, %c0_i32 : i32, i32
  }
  func.func @transform_2(%arg0: i32, %arg1: i32) -> (i32, i32) {
    %c0_i32 = arith.constant 0 : i32
    %c0_i32_0 = arith.constant 0 : i32
    return %c0_i32, %arg1 : i32, i32
  }
  func.func @transform_3(%arg0: i32, %arg1: i32) -> (i32, i32) {
    %c0_i32 = arith.constant 0 : i32
    %c0_i32_0 = arith.constant 0 : i32
    return %c0_i32, %arg1 : i32, i32
  }
  func.func @transform_4(%arg0: i32, %arg1: i32) -> (i32, i32) {
    %c0_i32 = arith.constant 0 : i32
    return %arg0, %arg1 : i32, i32
  }
}

</mosaic_0001>

<bundles_post_ra>
// kernel: tpu_custom_call.1
= control target key start
LH: loop header
LB: loop body
LE: loop exit
PB: predicated region body
PF: predicated region fallthrough
CT: control target
= control target key end

     0   :  { %9 = vsyncpa [#allocation5], 0  ;;  %s1173_s0 = inlined_call_operand.hbm [shape: f32[3], index: 0, kind: input, shape index: {}]   ;;  %s1174_s1 = inlined_call_operand.hbm [shape: f32[16,32], index: 1, kind: input, shape index: {}]   ;;  %s1175_s2 = inlined_call_operand.hbm [shape: f32[32,32], index: 2, kind: input, shape index: {}]   ;;  %s1176_s3 = inlined_call_operand.vmem [shape: f32[1,32], index: 3, kind: input, shape index: {}]   ;;  %s1177_s4 = inlined_call_operand.hbm [shape: f32[16,32], index: 4, kind: output, shape index: {}]  }
   0x1   :  { %10 = vsyncpa [#allocation3], 0 }
   0x2   :  { %12 = vsyncpa [#allocation3 + $0x1], 0 }
   0x3   :  { %13 = vsyncpa [#allocation8], 0 }
   0x4   :  { %14 = vsyncpa [#allocation4], 0 }
   0x5   :  { %16 = vsyncpa [#allocation4 + $0x1], 0  ;;  %s922_s15 = smov 0   ;;  %s924_s16 = smov 0  }
   0x6   :  { %s926_s17 = smov 0   ;;  %s928_s18 = smov 0  }
   0x7   :  { %s930_s19 = smov 0   ;;  %s932_s20 = smov 0  }
   0x8 LB: > { %s586_s21 = sadd.s32 4294967295, %s885_s20   ;;  %s587_s22 = sadd.s32 4294967294, %s885_s20   ;;  %s885_s20 = sphi %s932_s20, %s22_s20   ;;  %s881_s19 = sphi %s930_s19, %s1199_s19   ;;  %s877_s18 = sphi %s928_s18, %s1198_s18   ;;  %s873_s17 = sphi %s926_s17, %s1197_s17   ;;  %s869_s16 = sphi %s924_s16, %s1196_s16   ;;  %s865_s15 = sphi %s922_s15, %s1195_s15  }
   0x9   : > { %p75_p0 = scmp.ne.s32.totalorder %s869_s16, %s865_s15  ;;  %p956_p1 = scmp.eq.s32.totalorder %s586_s21, 0 }
   0xa   : > { %p960_p2 = scmp.eq.s32.totalorder %s586_s21, 1  ;;  %p159_p3 = scmp.eq.s32.totalorder %s587_s22, 1 }
   0xb   : > { %s1182_s23 = scalar_select %p956_p1, 1, 0 }
   0xc   : > { %p966_p4 = por %p956_p1, %p75_p0  ;;  %p588_p5 = scmp.ge.s32.totalorder %s885_s20, 1 }
   0xd   : > { %p971_p6 = por %p159_p3, %p75_p0  ;;  %p166_p7 = scmp.lt.s32.totalorder %s885_s20, 3 }
   0xe   : > { %s1184_s25 = scalar_select %p966_p4, 1, 0 }
   0xf   : > { %s1185_s26 = scalar_select %p971_p6, 1, 0 }
  0x10   : > { %p976_p8 = pnand %p588_p5, %p166_p7  ;;  %s887_s28 = smov [#allocation7]  }
  0x11   : > { %s189_s29 = sshll.u32 %s887_s28, 4  ;;  %s724_s7 = scalar_lea.hbm %s1173_s0, 16  ;;  %s983_s29 = int_to_ptr.vmem [resolvable:$true] %s189_s29 }
  0x12   : > { %p647_p10 = pneg %p976_p8  ;;  %p725_p12 = scmp.ne.s32.totalorder %s1173_s0, %s724_s7 }
  0x13   : > { %p731_p5 = scmp.lt.u32.totalorder %s724_s7, %s1173_s0 }
  0x14   : > { %p987_p11 = pnand %p647_p10, %p956_p1 }
  0x16   : > { %p726_p13 = pneg %p987_p11 }
  0x18   : > { %p727_p0 = pnand %p726_p13, %p725_p12 }
  0x1a   : > { %p728_p3 = pneg %p727_p0 }
  0x1c   : > { %p733_p7 = pnand %p731_p5, %p728_p3 }
  0x1e   : > { %736 = shalt.err (!%p733_p7)
}
  0x1f   : > { %s888_s12 = smov [#allocation2]   ;;  %s737_s28 = scalar_lea.hbm %s1175_s2, 512 }
  0x20   : > { %650 = dma.hbm_to_smem (!%p987_p11), %s1173_s0, 16, %s888_s12, [#allocation5]  }
  0x21   : > { %p738_p10 = scmp.ne.s32.totalorder %s1175_s2, %s737_s28  ;;  %p744_p3 = scmp.lt.u32.totalorder %s737_s28, %s1175_s2 }
  0x23   : > { %p740_p12 = pnand %p738_p10, %p726_p13 }
  0x25   : > { %p741_p0 = pneg %p740_p12 }
  0x27   : > { %p746_p5 = pnand %p744_p3, %p741_p0 }
  0x29   : > { %749 = shalt.err (!%p746_p5)
}
  0x2a   : > { %s750_s9 = scalar_lea.vmem %s983_s29, 512  ;;  %p758_p4 = scmp.lt.s32.totalorder %s983_s29, %s983_s29 }
  0x2b   : > { %p751_p7 = scmp.ne.s32.totalorder %s983_s29, %s750_s9  ;;  %p759_p10 = scmp.lt.s32.totalorder %s750_s9, %s750_s9 }
  0x2d   : > { %p753_p9 = pnand %p751_p7, %p726_p13  ;;  %p760_p12 = por %p759_p10, %p758_p4 }
  0x2f   : > { %p754_p6 = pneg %p753_p9 }
  0x31   : > { %p761_p1 = pnand %p760_p12, %p754_p6 }
  0x33   : > { %764 = shalt.err (!%p761_p1)
}
  0x34   : > { %s889_s10 = smov 128   ;;  %s890_s11 = smov 8  }
  0x35   : > { %653 = dma.hbm_to_vmem [thread:$0]  (!%p987_p11), %s1175_s2, 512, %s983_s29, [#allocation8], %s889_s10, %s889_s10, %s890_s11  }
  0x36   : > { %s34_s14 = sadd.s32 1, %s881_s19  ;;  %s62_s21 = sadd.s32 1, %s873_s17 }
  0x37   : > { %p36_p1 = scmp.ge.s32.totalorder %s34_s14, 2  ;;  %p69_p4 = scmp.ne.s32.totalorder %s873_s17, %s869_s16 }
  0x38   : > { %p70_p6 = scmp.eq.s32.totalorder %s885_s20, 0  ;;  %p664_p9 = scmp.lt.s32.totalorder %s885_s20, 2 }
  0x39   : > { %s1201_s14 = smov (%p36_p1, %s34_s14), 0  ;;  %p1045_p0 = por %p960_p2, %p69_p4 }
  0x3a   : > { %p71_p13 = por %p70_p6, %p69_p4  ;;  %s59_s30 = ssub.s32 %s881_s19, %s1201_s14 }
  0x3b   : > { %s1188_s22 = scalar_select %p1045_p0, 1, 0 }
  0x3c   : > { %s209_s28 = sand.u32 1, %s873_s17   ;;  %p60_p3 = scmp.eq.s32.totalorder %s59_s30, 0 }
  0x3d   : > { %s593_s29 = sshll.u32 %s209_s28, 3  ;;  %s594_s5 = sshll.u32 %s881_s19, 7 }
  0x3e   : > { %s1054_s6 = scalar_select %p60_p3, %s873_s17, %s62_s21  }
  0x3f   : > { %s1059_s9 = scalar_lea.hbm %s1174_s1, %s594_s5  ;;  %s213_s24 = scalar_lea.vmem [#allocation6], %s593_s29 }
  0x40   : > { %s220_s10 = sshll.u32 %s213_s24, 4  ;;  %p1063_p2 = pnand %p664_p9, %p71_p13  ;;  %s1067_s10 = int_to_ptr.vmem [resolvable:$true] %s220_s10 }
  0x41   : > { %s210_s12 = scalar_lea.sflag [#allocation3], %s209_s28  ;;  %s765_s13 = scalar_lea.hbm %s1059_s9, 128 }
  0x42   : > { %p766_p11 = scmp.ne.s32.totalorder %s1059_s9, %s765_s13  ;;  %p767_p5 = pneg %p1063_p2 }
  0x43   : > { %s770_s29 = scalar_lea.hbm %s1174_s1, 256  ;;  %p771_p12 = scmp.lt.u32.totalorder %s1059_s9, %s1174_s1 }
  0x44   : > { %p768_p7 = pnand %p767_p5, %p766_p11  ;;  %p772_p1 = scmp.lt.u32.totalorder %s770_s29, %s765_s13 }
  0x45   : > { %p774_p6 = scmp.lt.u32.totalorder %s765_s13, %s1059_s9 }
  0x46   : > { %p769_p10 = pneg %p768_p7  ;;  %p773_p4 = por %p772_p1, %p771_p12 }
  0x48   : > { %p775_p9 = por %p774_p6, %p773_p4 }
  0x4a   : > { %p776_p13 = pnand %p775_p9, %p769_p10 }
  0x4c   : > { %779 = shalt.err (!%p776_p13)
}
  0x4d   : > { %s780_s28 = scalar_lea.vmem %s1067_s10, 128  ;;  %s891_s8 = smov [#allocation6]  }
  0x4e   : > { %p781_p3 = scmp.ne.s32.totalorder %s1067_s10, %s780_s28  ;;  %s785_s24 = sshll.u32 %s891_s8, 4  ;;  %s786_s24 = int_to_ptr.vmem [resolvable:$false] %s785_s24 }
  0x4f   : > { %s787_s21 = scalar_lea.vmem %s786_s24, 256  ;;  %p788_p0 = scmp.lt.s32.totalorder %s1067_s10, %s786_s24 }
  0x50   : > { %p783_p11 = pnand %p781_p3, %p767_p5  ;;  %p789_p12 = scmp.lt.s32.totalorder %s787_s21, %s780_s28 }
  0x52   : > { %p784_p7 = pneg %p783_p11  ;;  %p790_p1 = por %p789_p12, %p788_p0 }
  0x54   : > { %p791_p4 = pnand %p790_p1, %p784_p7 }
  0x56   : > { %794 = shalt.err (!%p791_p4)
}
  0x57   : > { %657 = dma.hbm_to_vmem [thread:$0]  (!%p1063_p2), %s1059_s9, 128, %s1067_s10, %s210_s12  }
  0x58   : > { %229 = sbr.rel (%p976_p8) target bundleno = 462 (0x1ce), region = 36  ;;  %p1190_p5 = scmp.ne.s32.totalorder (!%p976_p8), %s1182_s23, 0 }
  0x5f   : > { %848 = dma.done.wait (%p1190_p5), [#allocation5], 16  }
  0x60   : > { %850 = vsyncadd (%p1190_p5), [#allocation5], 4294967280  ;;  %s1101_s13 = sand.u32 1, %s869_s16   ;;  %p1191_p0 = scmp.ne.s32.totalorder %s1184_s25, 0 }
  0x61   : > { %s597_s11 = sshll.u32 %s1101_s13, 3  ;;  %s236_s30 = scalar_lea.sflag [#allocation3], %s1101_s13 }
  0x62   : > { %s239_s9 = scalar_lea.vmem [#allocation6], %s597_s11 }
  0x63   : > { %852 = dma.done.wait (%p1191_p0), %s236_s30, 128  }
  0x64   : > { %854 = vsyncadd (%p1191_p0), %s236_s30, 4294967168 }
  0x65   : > { %856 = dma.done.wait (%p1190_p5), [#allocation8], 512  }
  0x66   : > { %858 = vsyncadd (%p1190_p5), [#allocation8], 4294966784 }
  0x67   : > { %248 = sfence }
  0x68   : > { %v275_v0 = vld [vmem:[%s239_s9] sm:$0xff]  ;;  %v276_v1 = vld [vmem:[#allocation7] sm:$0xff]  ;;  %v277_v2 = vld [vmem:[#allocation7 + $0x8] sm:$0xff]  ;;  %s892_s27 = smov 112   ;;  %v893_v3 = vmov 0.0|0.0   ;;  %vm894_vm0 = vmmov 0  }
  0x69   : > { %355 = vrot.lane.b32.xlu0 %v275_v0, %s892_s27  ;;  %629 = vmatprep.subr.bf16.mxu0 %v893_v3  ;;  %v630_v4 = vpack.c.bf16 %v277_v2, %v276_v1  ;;  %v353_v5 = vld [vmem:[#allocation7 + $0x10] sm:$0xff]  ;;  %v354_v6 = vld [vmem:[#allocation7 + $0x18] sm:$0xff]  ;;  %v895_v8 = vmov 0.0   ;;  %vm278_vm1 = vcmask 130048   ;;  %s602_s23 = sld [smem:[#allocation2 + $0x1]]  ;;  %s435_s25 = sld [smem:[#allocation2]] }
  0x6a   : > { %632 = vmatprep.subr.bf16.mxu1 %v893_v3  ;;  %v633_v7 = vpack.c.bf16 %v354_v6, %v353_v5  ;;  %619 = vmatprep.mubr.msk.f32.mxu0 %vm894_vm0, %v895_v8  ;;  %s603_s10 = sld [smem:[#allocation2 + $0x2]]  ;;  %v604_v28 = vld [vmem:[%s1176_s3] ss:$0 sm:$0xff]  ;;  %s606_s5 = sshll.u32 %s877_s18, 7  ;;  %vm454_vm2 = vcmask 261120  }
  0x6b   : > { %631 = vmatpush3.bf16.msra.mxu0 %v630_v4  ;;  %626 = vmatprep.mubr.msk.f32.mxu1 %vm894_vm0, %v895_v8  ;;  %s271_s7 = scalar_lea.vmem [#allocation9], %s597_s11  ;;  %s1124_s21 = scalar_lea.hbm %s1177_s4, %s606_s5 }
  0x6c   : > { %634 = vmatpush3.bf16.msra.mxu1 %v633_v7  ;;  %s471_s28 = sshll.u32 %s271_s7, 4  ;;  %s457_s30 = scalar_lea.sflag [#allocation4], %s1101_s13  ;;  %s1126_s28 = int_to_ptr.vmem [resolvable:$true] %s471_s28 }
  0x6d   : > { %s795_s9 = scalar_lea.vmem %s1126_s28, 128  ;;  %p1192_p2 = scmp.ne.s32.totalorder %s1188_s22, 0 }
  0x6e   : > { %620 = vmatmul.mubr.msk.f32.vlgmr.msra.gmra.mrb[0].mxu0 %vm278_vm1, %v275_v0  ;;  %p796_p8 = scmp.ne.s32.totalorder %s1126_s28, %s795_s9  ;;  %s896_s18 = smov [#allocation9]  }
  0x6f   : > { %v433_v18 = vstv %s602_s23  ;;  %v436_v23 = vstv %s435_s25  ;;  %s799_s11 = sshll.u32 %s896_s18, 4  ;;  %s800_s11 = int_to_ptr.vmem [resolvable:$false] %s799_s11 }
  0x70   : > { %v443_v24 = vstv %s603_s10  ;;  %p797_p10 = pnand %p796_p8, %p1192_p2  ;;  %s801_s27 = scalar_lea.vmem %s800_s11, 256 }
  0x71   : > { %p802_p9 = scmp.lt.s32.totalorder %s1126_s28, %s800_s11  ;;  %p803_p13 = scmp.lt.s32.totalorder %s801_s27, %s795_s9 }
  0x72   : > { %p798_p6 = pneg %p797_p10 }
  0x73   : > { %p804_p3 = por %p803_p13, %p802_p9 }
  0x75   : > { %p805_p11 = pnand %p804_p3, %p798_p6 }
  0xdb   : > { %v356_v9 = vpop.permute.xlu0 %355 }
  0xdc   : > { %627 = vmatmul.mubr.msk.f32.vlgmr.msra.gmra.mrb[0].mxu1 %vm278_vm1, %v356_v9 }
 0x141   : > { %v348_v10 = vpop.f32.mrb[0].mxu0 }
 0x142   : > { %v621_v11 = vpop.f32.mrb[1].mxu0  ;;  %v352_v12 = vmul.f32 %v348_v10, %v348_v10 }
 0x1af   : > { %v425_v13 = vpop.f32.mrb[0].mxu1 }
 0x1b0   : > { %v429_v14 = vadd.f32 %v425_v13, %v348_v10  ;;  %v430_v15 = vmul.f32 %v425_v13, %v425_v13  ;;  %v628_v16 = vpop.f32.mrb[1].mxu1 }
 0x1b2   : > { %v431_v17 = vadd.f32 %v430_v15, %v352_v12  ;;  %v438_v19 = vmul.f32 %v429_v14, %v429_v14  ;;  %v434_v21 = vmul.f32 %v433_v18, %v429_v14 }
 0x1b4   : > { %v439_v20 = vsub.f32 0.0, %v431_v17  ;;  %v437_v26 = vadd.f32 %v436_v23, %v434_v21 }
 0x1b6   : > { %v440_v22 = vadd.f32 %v439_v20, %v438_v19 }
 0x1b8   : > { %v441_v25 = vmul.f32 0.5, %v440_v22 }
 0x1ba   : > { %v444_v27 = vmul.f32 %v443_v24, %v441_v25 }
 0x1bc   : > { %v445_v29 = vadd.f32 %v444_v27, %v437_v26 }
 0x1be   : > { %v453_v30 = vadd.f32 %v604_v28, %v445_v29 }
 0x1c0   : > { %455 = vst.msk [vmem:[%s271_s7] sm:$0xff] %vm454_vm2, %v453_v30 }
 0x1c1   : > { %808 = shalt.err (!%p805_p11)
}
 0x1c2   : > { %s809_s13 = scalar_lea.hbm %s1124_s21, 128  ;;  %s813_s10 = scalar_lea.hbm %s1177_s4, 256 }
 0x1c3   : > { %p810_p7 = scmp.ne.s32.totalorder %s1124_s21, %s809_s13  ;;  %p814_p4 = scmp.lt.u32.totalorder %s1124_s21, %s1177_s4 }
 0x1c4   : > { %p815_p5 = scmp.lt.u32.totalorder %s813_s10, %s809_s13  ;;  %p817_p8 = scmp.lt.u32.totalorder %s809_s13, %s1124_s21 }
 0x1c5   : > { %p811_p12 = pnand %p810_p7, %p1192_p2 }
 0x1c6   : > { %p816_p0 = por %p815_p5, %p814_p4 }
 0x1c7   : > { %p812_p1 = pneg %p811_p12 }
 0x1c8   : > { %p818_p10 = por %p817_p8, %p816_p0 }
 0x1ca   : > { %p819_p6 = pnand %p818_p10, %p812_p1 }
 0x1cc   : > { %822 = shalt.err (!%p819_p6)
}
 0x1cd   : > { %645 = dma.vmem_to_hbm [thread:$0]  (%p1192_p2), %s1126_s28, 128, %s1124_s21, %s457_s30  }
 0x1ce PF: > { %s483_s5 = sand.u32 1, %s865_s15   ;;  %p1193_p9 = scmp.ne.s32.totalorder %s1185_s26, 0 }
 0x1cf   : > { %p1194_p13 = scmp.ge.s32.totalorder %s885_s20, 2  ;;  %s484_s7 = scalar_lea.sflag [#allocation4], %s483_s5 }
 0x1d1   : > { %p659_p3 = pnand %p1194_p13, %p1193_p9 }
 0x1d3   : > { %860 = dma.done.wait (!%p659_p3), %s484_s7, 128  }
 0x1d4   : > { %862 = vsyncadd (!%p659_p3), %s484_s7, 4294967168  ;;  %s22_s20 = sadd.s32 1, %s885_s20   ;;  %s1195_s15 = smov %s869_s16 }
 0x1d5   : > { %p19_p11 = scmp.ge.s32.totalorder %s22_s20, 4   ;;  %s1196_s16 = smov %s873_s17 }
 0x1d6   : > { %s1197_s17 = smov %s1054_s6  ;;  %s1198_s18 = smov %s881_s19 }
 0x1d7   : > { %s1199_s19 = smov %s1201_s14  ;;  %21 = sbr.rel (!%p19_p11) target bundleno = 8 (0x8), region = 94 }
 0x1de   :  { %489 = vsyncpa [#allocation3], 1 }
 0x1df   :  { %491 = vsyncpa [#allocation3 + $0x1], 1 }
 0x1e0   :  { %492 = vsyncpa [#allocation8], 1 }
 0x1e1   :  { %493 = vsyncpa [#allocation4], 1 }
 0x1e2   :  { %495 = vsyncpa [#allocation4 + $0x1], 1 }
 0x1e3   :  { %496 = vsyncpa [#allocation5], 1 }
 0x1e4   :  { %498 = vsyncpa [#allocation5 + $0x1], 1 }

</bundles_post_ra>
